<compile_context>
chip_gen: v7x
topology: tpu7x:2x2x1
jax: 0.10.0
libtpu: 0.0.40
codegen_flags: <defaults>
</compile_context>

<pallas_src>
import functools

import jax
import jax.numpy as jnp
from jax.experimental import pallas as pl
from jax.experimental.pallas import tpu as pltpu

_LANE = 128
_SUBLANE = 8


def _round_up(x: int, m: int) -> int:
    return (x + m - 1) // m * m


def _vmem_capacity_bytes() -> int:
    # Query the part's VMEM; fall back to the 128 MiB of v5e/v6e if unavailable.
    try:
        return int(pltpu.get_tpu_info().vmem_capacity_bytes)
    except Exception:
        return 128 * 1024 * 1024


def _topk_gate_kernel(x_ref, wt_ref, bias_ref, gates_ref, *, num_experts: int):
    # x_ref:     (tile_n, gate_dim)      activations, native dtype (bf16/f32)
    # wt_ref:    (gate_dim, e_pad)       pre-transposed weight, zero-padded cols
    # bias_ref:  (1, e_pad) f32          0 for valid experts, -1e30 for padding
    # gates_ref: (tile_n, num_experts)   softmax gates
    logits = jnp.dot(
        x_ref[...], wt_ref[...], preferred_element_type=jnp.float32
    )  # (tile_n, e_pad) f32 on the MXU
    logits = logits + bias_ref[...]  # mask padded expert columns (broadcast add)

    # Numerically stable softmax over the (lane-dense) expert axis, in f32.
    m = jnp.max(logits, axis=-1, keepdims=True)     # XLU lane reduction
    e = jnp.exp(logits - m)                          # EUP
    denom = jnp.sum(e, axis=-1, keepdims=True)
    gates = e / denom                                # exact normalization

    # Store only the real experts (masked vst; no post-call slice pass).
    gates_ref[...] = gates[:, :num_experts].astype(gates_ref.dtype)


def topk_gate_forward(gate_input: jax.Array, wg_weight: jax.Array,
                      *, tile_n: int | None = None) -> jax.Array:
    """gate_input: [N, gate_dim]; wg_weight: [num_experts, gate_dim] (PyTorch layout).

    Returns softmax(gate_input @ wg_weight.T, axis=1) with shape [N, num_experts].
    """
    n, gate_dim = gate_input.shape
    num_experts, w_gate_dim = wg_weight.shape
    assert w_gate_dim == gate_dim, "weight / input gate_dim mismatch"

    in_dtype = gate_input.dtype
    out_dtype = gate_input.dtype
    in_itemsize = jnp.dtype(in_dtype).itemsize
    out_itemsize = jnp.dtype(out_dtype).itemsize

    # TODO(synk): when activations are bf16 the routing logits are computed from
    # bf16 operands (f32 accumulate); pass an f32 gate_input to emulate fp32_gate.
    e_pad = _round_up(num_experts, _LANE)

    # One-time XLA transpose + pad of the tiny gate weight: [gate_dim, e_pad].
    w_t = wg_weight.astype(in_dtype).T
    if e_pad != num_experts:
        w_t = jnp.pad(w_t, ((0, 0), (0, e_pad - num_experts)))

    # Additive pad mask row: 0 for valid experts, -1e30 for padded columns.
    bias = jnp.where(jnp.arange(e_pad) < num_experts, 0.0, -1e30)
    bias = bias.astype(jnp.float32).reshape(1, e_pad)

    # ---- VMEM-aware token-tile sizing (big on v5e/v6e, capped on v7x). ----
    vmem_cap = _vmem_capacity_bytes()
    budget = int(0.75 * vmem_cap)
    w_bytes = gate_dim * e_pad * in_itemsize
    per_token = (
        2 * gate_dim * in_itemsize      # double-buffered x tile
        + 2 * e_pad * out_itemsize      # double-buffered out tile (lane-padded)
        + 4 * e_pad * 4                 # f32 body intermediates (logits/exp/...)
    )
    avail = max(budget - 2 * w_bytes - 2 * e_pad * 4, per_token * _SUBLANE)
    if tile_n is None:
        tile_n = max(avail // per_token, _SUBLANE)
        if tile_n >= 256:
            tile_n = (tile_n // 256) * 256
        else:
            tile_n = (tile_n // _SUBLANE) * _SUBLANE
        tile_n = min(tile_n, 4096)
    if tile_n >= n:
        tile_n = n  # full-extent block (always legal)

    grid = (pl.cdiv(n, tile_n),)

    vmem_need = (
        2 * tile_n * gate_dim * in_itemsize
        + 2 * w_bytes
        + 2 * tile_n * e_pad * out_itemsize
        + 4 * tile_n * e_pad * 4
        + 2 * e_pad * 4
        + (2 << 20)
    )
    vmem_limit = int(min(max(vmem_need, 16 * 1024 * 1024), int(0.9 * vmem_cap)))

    # Grid-invariant weight: single-buffer it to recover VMEM (one DMA ever runs).
    if hasattr(pl, "Buffered"):
        w_spec = pl.BlockSpec((gate_dim, e_pad), lambda i: (0, 0),
                              pipeline_mode=pl.Buffered(1))
    else:
        w_spec = pl.BlockSpec((gate_dim, e_pad), lambda i: (0, 0))

    cost = pl.CostEstimate(
        flops=2 * n * gate_dim * e_pad,
        transcendentals=n * e_pad,
        bytes_accessed=(
            n * gate_dim * in_itemsize
            + gate_dim * e_pad * in_itemsize
            + n * num_experts * out_itemsize
        ),
    )

    gates = pl.pallas_call(
        functools.partial(_topk_gate_kernel, num_experts=num_experts),
        out_shape=jax.ShapeDtypeStruct((n, num_experts), out_dtype),
        grid_spec=pl.GridSpec(
            grid=grid,
            in_specs=[
                pl.BlockSpec((tile_n, gate_dim), lambda i: (i, 0)),  # x tiles
                w_spec,                                              # resident W^T
                pl.BlockSpec((1, e_pad), lambda i: (0, 0)),          # pad-mask row
            ],
            out_specs=pl.BlockSpec((tile_n, num_experts), lambda i: (i, 0)),
        ),
        compiler_params=pltpu.CompilerParams(
            # TODO(synk): on v7x (2 TCs/chip) confirm in xprof that this parallel
            # token axis shards across both cores; add a CORE_PARALLEL axis if not.
            dimension_semantics=("parallel",),
            vmem_limit_bytes=vmem_limit,
        ),
        cost_estimate=cost,
    )(gate_input, w_t, bias)

    return gates


def _reference(gate_input, wg_weight):
    logits = gate_input @ wg_weight.T
    return jax.nn.softmax(logits, axis=1)


if __name__ == "__main__":
    key = jax.random.PRNGKey(0)
    k_x, k_w = jax.random.split(key)

    # Small shapes consistent with the module: N tokens of dim model_dim,
    # gated over num_global_experts experts.
    N = 8
    MODEL_DIM = 32
    NUM_EXPERTS = 4

    gate_input = jax.random.normal(k_x, (N, MODEL_DIM), dtype=jnp.float32)
    # Deterministic init of nn.Linear(model_dim, num_experts, bias=False) weight
    # (PyTorch layout [num_experts, model_dim]).
    wg_weight = (
        jax.random.uniform(k_w, (NUM_EXPERTS, MODEL_DIM), dtype=jnp.float32) - 0.5
    ) * (2.0 / (MODEL_DIM ** 0.5))

    gates = topk_gate_forward(gate_input, wg_weight)
    gates = jax.block_until_ready(gates)

    ref = _reference(gate_input, wg_weight)
    assert gates.shape == (N, NUM_EXPERTS)
    assert jnp.allclose(gates, ref, atol=1e-3, rtol=1e-3), "mismatch vs reference"
    assert jnp.allclose(jnp.sum(gates, axis=1), 1.0, atol=1e-3)

    print("KERNEL_OK")
</pallas_src>

<mosaic_0001>
module attributes {stable_mosaic.version = 11 : i64} {
  func.func @_topk_gate_kernel(%arg0: i32, %arg1: memref<8x32xf32, #tpu.memory_space<vmem>>, %arg2: memref<32x128xf32, #tpu.memory_space<vmem>>, %arg3: memref<1x128xf32, #tpu.memory_space<vmem>>, %arg4: memref<8x4xf32, #tpu.memory_space<vmem>>) attributes {dimension_semantics = [#tpu.dimension_semantics<parallel>], iteration_bounds = array<i64: 1>, scalar_prefetch = 0 : i64, scratch_operands = 0 : i64, tpu.core_type = #tpu.core_type<tc>, window_params = [{transform_indices = @transform_0, window_bounds = array<i64: 8, 32>}, {pipeline_mode = #tpu.pipeline_mode<synchronous>, transform_indices = @transform_1, window_bounds = array<i64: 32, 128>}, {pipeline_mode = #tpu.pipeline_mode<synchronous>, transform_indices = @transform_2, window_bounds = array<i64: 1, 128>}, {transform_indices = @transform_3, window_bounds = array<i64: 8, 4>}]} {
    %c0 = arith.constant 0 : index
    %c0_0 = arith.constant 0 : index
    %0 = vector.load %arg1[%c0, %c0_0] : memref<8x32xf32, #tpu.memory_space<vmem>>, vector<8x32xf32>
    %c0_1 = arith.constant 0 : index
    %c0_2 = arith.constant 0 : index
    %1 = vector.load %arg2[%c0_1, %c0_2] : memref<32x128xf32, #tpu.memory_space<vmem>>, vector<32x128xf32>
    %cst = arith.constant dense<0.000000e+00> : vector<8x128xf32>
    %2 = tpu.matmul %0, %1, %cst {dimension_numbers = #tpu.dot_dimension_numbers<[1], [0], [0], [1], [0, 0, 1, 1], [], []>} : vector<8x32xf32>, vector<32x128xf32>, vector<8x128xf32> -> vector<8x128xf32>
    %c0_3 = arith.constant 0 : index
    %c0_4 = arith.constant 0 : index
    %3 = vector.load %arg3[%c0_3, %c0_4] : memref<1x128xf32, #tpu.memory_space<vmem>>, vector<1x128xf32>
    %4 = vector.broadcast %3 : vector<1x128xf32> to vector<8x128xf32>
    %5 = arith.addf %2, %4 : vector<8x128xf32>
    %cst_5 = arith.constant dense<0xFF800000> : vector<8xf32>
    %6 = vector.multi_reduction <maximumf>, %5, %cst_5 [1] : vector<8x128xf32> to vector<8xf32>
    %7 = vector.shape_cast %6 : vector<8xf32> to vector<8x1xf32>
    %8 = vector.broadcast %7 : vector<8x1xf32> to vector<8x128xf32>
    %9 = arith.subf %5, %8 : vector<8x128xf32>
    %10 = math.exp %9 : vector<8x128xf32>
    %cst_6 = arith.constant dense<0.000000e+00> : vector<8xf32>
    %11 = vector.multi_reduction <add>, %10, %cst_6 [1] : vector<8x128xf32> to vector<8xf32>
    %12 = vector.shape_cast %11 : vector<8xf32> to vector<8x1xf32>
    %13 = vector.broadcast %12 : vector<8x1xf32> to vector<8x128xf32>
    %14 = arith.divf %10, %13 : vector<8x128xf32>
    %15 = vector.extract_strided_slice %14 {offsets = [0, 0], sizes = [8, 4], strides = [1, 1]} : vector<8x128xf32> to vector<8x4xf32>
    %c0_7 = arith.constant 0 : index
    %c0_8 = arith.constant 0 : index
    %16 = vector.load %arg4[%c0_7, %c0_8] : memref<8x4xf32, #tpu.memory_space<vmem>>, vector<8x4xf32>
    tpu.vector_store %arg4[%c0_7, %c0_8], %15 {strides = array<i32>} : memref<8x4xf32, #tpu.memory_space<vmem>>, vector<8x4xf32>,
    return
  }
  func.func @transform_0(%arg0: i32) -> (i32, i32) {
    %c0_i32 = arith.constant 0 : i32
    %c0_i32_0 = arith.constant 0 : i32
    return %arg0, %c0_i32 : i32, i32
  }
  func.func @transform_1(%arg0: i32) -> (i32, i32) {
    %c0_i32 = arith.constant 0 : i32
    %c0_i32_0 = arith.constant 0 : i32
    %c0_i32_1 = arith.constant 0 : i32
    return %c0_i32, %c0_i32_0 : i32, i32
  }
  func.func @transform_2(%arg0: i32) -> (i32, i32) {
    %c0_i32 = arith.constant 0 : i32
    %c0_i32_0 = arith.constant 0 : i32
    %c0_i32_1 = arith.constant 0 : i32
    return %c0_i32, %c0_i32_0 : i32, i32
  }
  func.func @transform_3(%arg0: i32) -> (i32, i32) {
    %c0_i32 = arith.constant 0 : i32
    %c0_i32_0 = arith.constant 0 : i32
    return %arg0, %c0_i32 : i32, i32
  }
}

</mosaic_0001>

<bundles_post_ra>
// kernel: tpu_custom_call.1
= control target key start
LH: loop header
LB: loop body
LE: loop exit
PB: predicated region body
PF: predicated region fallthrough
CT: control target
= control target key end

     0   :  { %8 = vsyncpa [#allocation3], 0  ;;  %s290_s0 = inlined_call_operand.hbm [shape: f32[8,32], index: 0, kind: input, shape index: {}]   ;;  %s291_s1 = inlined_call_operand.hbm [shape: f32[32,128], index: 1, kind: input, shape index: {}]   ;;  %s292_s2 = inlined_call_operand.vmem [shape: f32[1,128], index: 2, kind: input, shape index: {}]   ;;  %s293_s3 = inlined_call_operand.vmem [shape: f32[8,4], index: 3, kind: output, shape index: {}]  }
   0x1   :  { %9 = vsyncpa [#allocation5], 0  ;;  %s226_s12 = smov [#allocation2]   ;;  %s227_s14 = smov [#allocation4]  }
   0x2   :  { %s16_s13 = sshll.u32 %s226_s12, 4  ;;  %s25_s15 = sshll.u32 %s227_s14, 4  ;;  %s17_s13 = int_to_ptr.vmem [resolvable:$true] %s16_s13  ;;  %s253_s15 = int_to_ptr.vmem [resolvable:$true] %s25_s15 }
   0x3   :  { %s178_s18 = scalar_lea.hbm %s290_s0, 128 }
   0x4   :  { %p179_p0 = scmp.ne.s32.totalorder %s290_s0, %s178_s18  ;;  %p182_p1 = scmp.lt.u32.totalorder %s178_s18, %s290_s0 }
   0x6   :  { %p184_p2 = pnand %p182_p1, %p179_p0 }
   0x8   :  { %187 = shalt.err (!%p184_p2)
}
   0x9   :  { %s188_s23 = scalar_lea.vmem %s17_s13, 128  ;;  %p193_p4 = scmp.lt.s32.totalorder %s17_s13, %s17_s13 }
   0xa   :  { %p189_p3 = scmp.ne.s32.totalorder %s17_s13, %s188_s23  ;;  %p194_p5 = scmp.lt.s32.totalorder %s188_s23, %s188_s23 }
   0xc   :  { %p195_p6 = por %p194_p5, %p193_p4 }
   0xe   :  { %p196_p7 = pnand %p195_p6, %p189_p3 }
  0x10   :  { %199 = shalt.err (!%p196_p7)
}
  0x11   :  { %19 = dma.hbm_to_vmem [thread:$0]  %s290_s0, 128, %s17_s13, [#allocation3]  }
  0x12   :  { %s200_s28 = scalar_lea.hbm %s291_s1, 512 }
  0x13   :  { %p201_p8 = scmp.ne.s32.totalorder %s291_s1, %s200_s28  ;;  %p204_p9 = scmp.lt.u32.totalorder %s200_s28, %s291_s1 }
  0x15   :  { %p206_p10 = pnand %p204_p9, %p201_p8 }
  0x17   :  { %209 = shalt.err (!%p206_p10)
}
  0x18   :  { %s210_s6 = scalar_lea.vmem %s253_s15, 512  ;;  %p215_p12 = scmp.lt.s32.totalorder %s253_s15, %s253_s15 }
  0x19   :  { %p211_p11 = scmp.ne.s32.totalorder %s253_s15, %s210_s6  ;;  %p216_p13 = scmp.lt.s32.totalorder %s210_s6, %s210_s6 }
  0x1b   :  { %p217_p0 = por %p216_p13, %p215_p12 }
  0x1d   :  { %p218_p1 = pnand %p217_p0, %p211_p11 }
  0x1f   :  { %221 = shalt.err (!%p218_p1)
}
  0x20   :  { %s228_s0 = smov 128   ;;  %s229_s7 = smov 8  }
  0x21   :  { %31 = dma.hbm_to_vmem [thread:$0]  %s291_s1, 512, %s253_s15, [#allocation5], %s228_s0, %s228_s0, %s229_s7  }
  0x22   :  { %222 = dma.done.wait [#allocation3], 128  }
  0x23   :  { %223 = vsyncadd [#allocation3], 4294967168 }
  0x24   :  { %224 = dma.done.wait [#allocation5], 512  }
  0x25   :  { %225 = vsyncadd [#allocation5], 4294966784  ;;  %v230_v0 = vmov 0.0|0.0   ;;  %vm231_vm0 = vmmov 0   ;;  %v232_v1 = vmov 0.0   ;;  %v41_v2 = vld [vmem:[#allocation4] sm:$0xff] }
  0x26   :  { %161 = vmatprep.subr.bf16.mxu0 %v230_v0  ;;  %158 = vmatprep.mubr.msk.f32.mxu0 %vm231_vm0, %v232_v1  ;;  %v42_v3 = vld [vmem:[#allocation4 + $0x8] sm:$0xff]  ;;  %v43_v4 = vld [vmem:[#allocation4 + $0x10] sm:$0xff]  ;;  %v44_v6 = vld [vmem:[#allocation4 + $0x18] sm:$0xff]  ;;  %vm52_vm1 = vcmask 261120   ;;  %vm135_vm2 = vcmask 31744  }
  0x27   :  { %v162_v5 = vpack.c.bf16 %v42_v3, %v41_v2  ;;  %v165_v7 = vpack.c.bf16 %v44_v6, %v43_v4  ;;  %v40_v8 = vld [vmem:[#allocation2] sm:$0xff]  ;;  %v143_v9 = vld [vmem:[%s292_s2] ss:$0 sm:$0xff] }
  0x29   :  { %163 = vmatpush3.bf16.msra.mxu0 %v162_v5 }
  0x2a   :  { %164 = vmatprep.subr.bf16.mxu0 %v230_v0 }
  0x2d   :  { %166 = vmatpush3.bf16.msra.mxu0 %v165_v7 }
  0x30   :  { %159 = vmatmul.mubr.msk.f32.vlgmr.msra.gmra.mrb[0].mxu0 %vm52_vm1, %v40_v8 }
 0x103   :  { %v122_v10 = vpop.f32.mrb[0].mxu0 }
 0x104   :  { %v123_v11 = vadd.f32 %v143_v9, %v122_v10  ;;  %v160_v12 = vpop.f32.mrb[1].mxu0 }
 0x106   :  { %126 = vmax.xlane.f32.xlu0 %v123_v11 }
 0x193   :  { %v127_v13 = vpop.xlane.xlu0 %126 }
 0x194   :  { %v128_v14 = vsub.f32 %v123_v11, %v127_v13 }
 0x196   :  { %v129_v15 = vmul.f32 1.442695, %v128_v14 }
 0x198   :  { %174 = vpow2.f32 %v129_v15 }
 0x1a2   :  { %v175_v16 = vpop.eup %174 }
 0x1a3   :  { %131 = vadd.xlane.f32.xlu0 %v175_v16 }
 0x230   :  { %v132_v17 = vpop.xlane.xlu0 %131 }
 0x231   :  { %176 = vrcp.f32 %v132_v17 }
 0x23b   :  { %v177_v18 = vpop.eup %176 }
 0x23c   :  { %v134_v19 = vmul.f32 %v177_v18, %v175_v16 }
 0x23e   :  { %136 = vst.msk [vmem:[%s293_s3] sm:$0xff] %vm135_vm2, %v134_v19 }
 0x23f   :  { %141 = vsyncpa [#allocation3], 1 }
 0x240   :  { %142 = vsyncpa [#allocation5], 1 }

</bundles_post_ra>
